<compile_context>
chip_gen: v7x
topology: tpu7x:2x2x1
jax: 0.10.0
libtpu: 0.0.40
codegen_flags: <defaults>
</compile_context>

<pallas_src>
import functools

import jax
import jax.numpy as jnp
from jax.experimental import pallas as pl
from jax.experimental.pallas import tpu as pltpu


_LANE = 128
_BLOCK_TARGET_BYTES = 4 * 1024 * 1024   # ~4 MiB blocks sit on the HBM-roofline plateau


def _round_up(n, m):
    return ((n + m - 1) // m) * m


def _chip_config():
    """Generation-aware VMEM budget / crossover / core-count heuristics."""
    vmem_capacity = 64 << 20  # conservative (v7x-like) fallback
    try:
        info = pltpu.get_tpu_info()
        vmem_capacity = int(getattr(info, "vmem_capacity_bytes", vmem_capacity)
                            or vmem_capacity)
    except Exception:
        pass
    big_vmem = vmem_capacity >= (100 << 20)       # v5e / v6e: 128 MiB per TC
    # Never ask for all of physical VMEM: leave >=16 MiB compiler headroom.
    vmem_cap = max(32 << 20, min(vmem_capacity - (16 << 20), 100 << 20))
    return {
        # Max per-batch-element (T, D) slab (HBM bytes) for the fused 1-read path.
        "slab_max": (16 << 20) if big_vmem else (4 << 20),
        "vmem_cap": vmem_cap,
        # Small-VMEM parts (v7x) have 2 TensorCores per chip; v5e/v6e have 1.
        "multi_core": not big_vmem,
    }


def _vmem_limit_bytes(block_elems, itemsize, cap):
    # Double-buffered input + output blocks plus ~2 f32 block-sized in-kernel
    # intermediates (the f32 cast / squared values), plus headroom.
    est = block_elems * itemsize * 4 + block_elems * 4 * 2 + (4 << 20)
    return int(min(cap, max(est, 32 << 20)))


def _normalized_scale(gx2, gamma):
    """(gamma * Nx + 1) from per-channel sum-of-squares gx2 (f32, (b, 1, D))."""
    gx = jnp.sqrt(gx2)                                            # (b, 1, D)
    d = gx.shape[-1]
    # Mean over the logical channel dim; Mosaic masks the lane reduction to D.
    mean = jnp.sum(gx, axis=-1, keepdims=True) * (1.0 / d)        # (b, 1, 1)
    denom = mean + 1e-6
    # EUP reciprocal + one Newton-Raphson step (~f32-exact); hides under DMA.
    inv = pl.reciprocal(denom, approx=True)
    inv = inv * (2.0 - denom * inv)
    nx = gx * inv                                                 # (b, 1, D)
    return gamma * nx + 1.0                                       # (b, 1, D)


# ---------------------------------------------------------------------------
# Kernels
# ---------------------------------------------------------------------------

def _grn_fused_kernel(x_ref, gamma_ref, beta_ref, o_ref):
    # Ragged last batch block: rows beyond B hold stale VMEM data; they are
    # computed on (per-row independent, possibly NaN/Inf — benign) but their
    # stores are masked by Pallas, so valid rows are unaffected.
    x = x_ref[...]                                   # stays in input dtype
    xf = x.astype(jnp.float32)
    gx2 = jnp.sum(xf * xf, axis=1, keepdims=True)    # f32 sum of squares over T
    scale = _normalized_scale(gx2, gamma_ref[...])
    # gamma * (x * Nx) + beta + x  ==  x * (gamma * Nx + 1) + beta
    o_ref[...] = (x * scale + beta_ref[...]).astype(o_ref.dtype)


def _grn_sumsq_kernel(x_ref, gx2_ref, *, seq_len, t_block, t_per_split):
    s = pl.program_id(1)
    t = pl.program_id(2)

    @pl.when(t == 0)
    def _():
        gx2_ref[...] = jnp.zeros_like(gx2_ref)

    # Mask rows past the end of the sequence (partial last tile, or a tile of
    # the last T-split that lies entirely past T). A few VPU ops, hidden by DMA.
    global_tile = s * t_per_split + t
    rows_left = seq_len - global_tile * t_block          # may be <= 0
    row_ids = jax.lax.broadcasted_iota(jnp.int32, x_ref.shape, 1)
    xf = jnp.where(row_ids < rows_left, x_ref[...].astype(jnp.float32), 0.0)
    gx2_ref[...] += jnp.sum(xf * xf, axis=1, keepdims=True)


def _grn_apply_kernel(x_ref, gx2_ref, gamma_ref, beta_ref, o_ref):
    # Partial last T tile: garbage tail rows are computed but their stores are
    # masked by Pallas (boundary block), so only valid rows reach HBM.
    scale = _normalized_scale(gx2_ref[...], gamma_ref[...])
    o_ref[...] = (x_ref[...] * scale + beta_ref[...]).astype(o_ref.dtype)


# ---------------------------------------------------------------------------
# Wrappers
# ---------------------------------------------------------------------------

def _grn_fused(x, gamma, beta, cfg, b_blk=None):
    """Single pallas_call: whole (T, D) slab(s) resident per grid step."""
    B, T, D = x.shape
    itemsize = x.dtype.itemsize
    lanes = _round_up(D, _LANE)                 # VMEM footprint uses padded lanes
    if b_blk is None:
        slab_hbm = max(1, T * D * itemsize)
        # Per batch element: in + out double-buffered + ~2 f32 intermediates.
        per_b_cost = 4 * T * lanes * itemsize + 2 * T * lanes * 4
        b_vmem_max = max(1, (cfg["vmem_cap"] - (4 << 20)) // max(1, per_b_cost))
        b_blk = max(1, min(B, _BLOCK_TARGET_BYTES // slab_hbm, b_vmem_max))
        if cfg["multi_core"] and B >= 2:
            # Keep >= 2 grid steps only on multi-TC parts (v7x megacore);
            # on single-TC v5e/v6e the grid is a serial loop and splitting
            # only shrinks DMAs and adds per-step overhead.
            b_blk = min(b_blk, pl.cdiv(B, 2))
    b_blk = int(max(1, min(b_blk, B)))
    grid_b = pl.cdiv(B, b_blk)

    return pl.pallas_call(
        _grn_fused_kernel,
        out_shape=jax.ShapeDtypeStruct((B, T, D), x.dtype),
        grid_spec=pltpu.PrefetchScalarGridSpec(
            num_scalar_prefetch=0,
            grid=(grid_b,),
            in_specs=[
                pl.BlockSpec((b_blk, T, D), lambda b: (b, 0, 0)),
                pl.BlockSpec((1, 1, D), lambda b: (0, 0, 0)),
                pl.BlockSpec((1, 1, D), lambda b: (0, 0, 0)),
            ],
            out_specs=pl.BlockSpec((b_blk, T, D), lambda b: (b, 0, 0)),
        ),
        compiler_params=pltpu.CompilerParams(
            dimension_semantics=("parallel",),
            vmem_limit_bytes=_vmem_limit_bytes(b_blk * T * lanes, itemsize,
                                               cfg["vmem_cap"]),
        ),
    )(x, gamma, beta)


def _grn_two_phase(x, gamma, beta, cfg, t_block=None, phase1_splits=None):
    """Two-pass scheme for long sequences: reduce over T tiles, then apply."""
    B, T, D = x.shape
    itemsize = x.dtype.itemsize
    lanes = _round_up(D, _LANE)

    if t_block is None:
        row_bytes = lanes * itemsize
        t_block = (_BLOCK_TARGET_BYTES // max(1, row_bytes)) // 8 * 8
        per_row = 4 * lanes * itemsize + 2 * lanes * 4
        t_vmem_max = ((cfg["vmem_cap"] - (8 << 20)) // max(1, per_row)) // 8 * 8
        t_block = max(8, min(t_block, t_vmem_max))
    else:
        t_block = max(8, (int(t_block) // 8) * 8)   # multiple of 8 (sublane)
    t_block = min(t_block, max(8, _round_up(T, 8)))
    n_t = pl.cdiv(T, t_block)
    vmem_limit = _vmem_limit_bytes(t_block * lanes, itemsize, cfg["vmem_cap"])

    # Optional parallel T split in phase 1 so both TensorCores (v7x) stream
    # HBM when the batch alone cannot feed two cores.
    if phase1_splits is None:
        phase1_splits = 2 if (cfg["multi_core"] and B == 1) else 1
    n_split = int(max(1, min(phase1_splits, n_t)))
    t_per_split = pl.cdiv(n_t, n_split)

    def sumsq_x_map(b, s, t):
        # Clamp so the last split never issues an out-of-range block DMA; the
        # in-kernel row mask zeroes any tile lying entirely past T.
        return (b, jnp.minimum(s * t_per_split + t, n_t - 1), 0)

    sumsq_kernel = functools.partial(
        _grn_sumsq_kernel, seq_len=T, t_block=t_block, t_per_split=t_per_split)

    # Phase 1: per-(batch, split, channel) partial sums of squares over T tiles.
    gx2_parts = pl.pallas_call(
        sumsq_kernel,
        out_shape=jax.ShapeDtypeStruct((B * n_split, 1, D), jnp.float32),
        grid_spec=pltpu.PrefetchScalarGridSpec(
            num_scalar_prefetch=0,
            grid=(B, n_split, t_per_split),
            in_specs=[pl.BlockSpec((1, t_block, D), sumsq_x_map)],
            out_specs=pl.BlockSpec((1, 1, D),
                                   lambda b, s, t: (b * n_split + s, 0, 0)),
        ),
        compiler_params=pltpu.CompilerParams(
            dimension_semantics=("parallel", "parallel", "arbitrary"),
            vmem_limit_bytes=vmem_limit,
        ),
    )(x)

    if n_split > 1:
        gx2 = gx2_parts.reshape(B, n_split, 1, D).sum(axis=1)   # tiny XLA reduce
    else:
        gx2 = gx2_parts                                         # already (B, 1, D)

    # Phase 2: apply gamma*(x*Nx) + beta + x tile by tile (no T/D pad or slice).
    out = pl.pallas_call(
        _grn_apply_kernel,
        out_shape=jax.ShapeDtypeStruct((B, T, D), x.dtype),
        grid_spec=pltpu.PrefetchScalarGridSpec(
            num_scalar_prefetch=0,
            grid=(B, n_t),
            in_specs=[
                pl.BlockSpec((1, t_block, D), lambda b, t: (b, t, 0)),
                pl.BlockSpec((1, 1, D), lambda b, t: (b, 0, 0)),
                pl.BlockSpec((1, 1, D), lambda b, t: (0, 0, 0)),
                pl.BlockSpec((1, 1, D), lambda b, t: (0, 0, 0)),
            ],
            out_specs=pl.BlockSpec((1, t_block, D), lambda b, t: (b, t, 0)),
        ),
        compiler_params=pltpu.CompilerParams(
            dimension_semantics=("parallel", "parallel"),
            vmem_limit_bytes=vmem_limit,
        ),
    )(x, gx2, gamma, beta)
    return out


def grn_pallas(x, gamma, beta, *, force_two_phase=False, t_block=None,
               phase1_splits=None, b_blk=None):
    """GRN forward. x: (B, T, D); gamma, beta broadcastable to (1, 1, D)."""
    B, T, D = x.shape
    # Hoisted one-time f32 cast of the (tiny) parameters.
    gamma = jnp.asarray(gamma, jnp.float32).reshape(1, 1, D)
    beta = jnp.asarray(beta, jnp.float32).reshape(1, 1, D)

    cfg = _chip_config()
    itemsize = x.dtype.itemsize
    lanes = _round_up(D, _LANE)
    slab_hbm = T * D * itemsize                       # one batch element in HBM
    per_b_cost = 4 * T * lanes * itemsize + 2 * T * lanes * 4   # VMEM per element

    fused_ok = (not force_two_phase
                and slab_hbm <= cfg["slab_max"]
                and per_b_cost + (4 << 20) <= cfg["vmem_cap"])
    if fused_ok:
        return _grn_fused(x, gamma, beta, cfg, b_blk=b_blk)
    return _grn_two_phase(x, gamma, beta, cfg, t_block=t_block,
                          phase1_splits=phase1_splits)


def grn_ref(x, gamma, beta):
    """Pure-JAX reference mirroring the PyTorch forward."""
    gx = jnp.linalg.norm(x, ord=2, axis=1, keepdims=True)       # (B, 1, D)
    nx = gx / (jnp.mean(gx, axis=-1, keepdims=True) + 1e-6)     # (B, 1, D)
    return gamma * (x * nx) + beta + x


if __name__ == "__main__":
    key = jax.random.PRNGKey(0)
    kx, kg, kb = jax.random.split(key, 3)

    # --- Test 1: small f32, fused single-phase path (D not multiple of 128) -
    B, T, D = 2, 8, 32
    x = jax.random.normal(kx, (B, T, D), dtype=jnp.float32)
    # Module zero-inits gamma/beta; use small random values so GRN is exercised.
    gamma = 0.1 * jax.random.normal(kg, (1, 1, D), dtype=jnp.float32)
    beta = 0.1 * jax.random.normal(kb, (1, 1, D), dtype=jnp.float32)

    out = jax.block_until_ready(grn_pallas(x, gamma, beta))
    ref = grn_ref(x, gamma, beta)
    assert out.shape == ref.shape
    assert jnp.allclose(out, ref, atol=1e-4, rtol=1e-4), (
        f"fused max err {jnp.max(jnp.abs(out - ref))}"
    )

    # --- Test 2: fused path with a ragged last batch block (B % b_blk != 0) --
    B4, T4, D4 = 9, 8, 32
    x4 = jax.random.normal(kx, (B4, T4, D4), dtype=jnp.float32)
    g4 = 0.1 * jax.random.normal(kg, (1, 1, D4), dtype=jnp.float32)
    b4 = 0.1 * jax.random.normal(kb, (1, 1, D4), dtype=jnp.float32)
    out4 = jax.block_until_ready(grn_pallas(x4, g4, b4, b_blk=4))
    ref4 = grn_ref(x4, g4, b4)
    assert jnp.allclose(out4, ref4, atol=1e-4, rtol=1e-4), (
        f"batched max err {jnp.max(jnp.abs(out4 - ref4))}"
    )

    # --- Test 3: two-phase path, unpadded D=160, ragged T tile, T-split of 2 -
    B2, T2, D2 = 2, 40, 160
    x2 = jax.random.normal(kx, (B2, T2, D2), dtype=jnp.float32)
    g2 = 0.1 * jax.random.normal(kg, (1, 1, D2), dtype=jnp.float32)
    b2 = 0.1 * jax.random.normal(kb, (1, 1, D2), dtype=jnp.float32)
    out2 = jax.block_until_ready(
        grn_pallas(x2, g2, b2, force_two_phase=True, t_block=16, phase1_splits=2)
    )
    ref2 = grn_ref(x2, g2, b2)
    assert jnp.allclose(out2, ref2, atol=1e-4, rtol=1e-4), (
        f"two-phase(split) max err {jnp.max(jnp.abs(out2 - ref2))}"
    )

    # --- Test 3b: two-phase path without the T split ------------------------
    out2b = jax.block_until_ready(
        grn_pallas(x2, g2, b2, force_two_phase=True, t_block=16, phase1_splits=1)
    )
    assert jnp.allclose(out2b, ref2, atol=1e-4, rtol=1e-4), (
        f"two-phase max err {jnp.max(jnp.abs(out2b - ref2))}"
    )

    # --- Test 4: bf16 inputs (f32 accumulation, bf16-preserving epilogue) ---
    xb = x.astype(jnp.bfloat16)
    outb = jax.block_until_ready(grn_pallas(xb, gamma, beta))
    refb = grn_ref(xb.astype(jnp.float32), gamma, beta)
    assert jnp.allclose(outb.astype(jnp.float32), refb, atol=5e-2, rtol=5e-2), (
        f"bf16 max err {jnp.max(jnp.abs(outb.astype(jnp.float32) - refb))}"
    )

    print("KERNEL_OK")
</pallas_src>

<mosaic_0001>
module attributes {stable_mosaic.version = 11 : i64} {
  func.func @_grn_fused_kernel(%arg0: i32, %arg1: memref<1x8x32xf32, #tpu.memory_space<vmem>>, %arg2: memref<1x1x32xf32, #tpu.memory_space<vmem>>, %arg3: memref<1x1x32xf32, #tpu.memory_space<vmem>>, %arg4: memref<1x8x32xf32, #tpu.memory_space<vmem>>) attributes {dimension_semantics = [#tpu.dimension_semantics<parallel>], iteration_bounds = array<i64: 2>, scalar_prefetch = 0 : i64, scratch_operands = 0 : i64, tpu.core_type = #tpu.core_type<tc>, window_params = [{transform_indices = @transform_0, window_bounds = array<i64: 1, 8, 32>}, {pipeline_mode = #tpu.pipeline_mode<synchronous>, transform_indices = @transform_1, window_bounds = array<i64: 1, 1, 32>}, {pipeline_mode = #tpu.pipeline_mode<synchronous>, transform_indices = @transform_2, window_bounds = array<i64: 1, 1, 32>}, {transform_indices = @transform_3, window_bounds = array<i64: 1, 8, 32>}]} {
    %c0 = arith.constant 0 : index
    %c0_0 = arith.constant 0 : index
    %c0_1 = arith.constant 0 : index
    %0 = vector.load %arg1[%c0, %c0_0, %c0_1] : memref<1x8x32xf32, #tpu.memory_space<vmem>>, vector<1x8x32xf32>
    %1 = arith.mulf %0, %0 : vector<1x8x32xf32>
    %cst = arith.constant dense<0.000000e+00> : vector<1x32xf32>
    %2 = vector.multi_reduction <add>, %1, %cst [1] : vector<1x8x32xf32> to vector<1x32xf32>
    %3 = vector.shape_cast %2 : vector<1x32xf32> to vector<1x1x32xf32>
    %c0_2 = arith.constant 0 : index
    %c0_3 = arith.constant 0 : index
    %c0_4 = arith.constant 0 : index
    %4 = vector.load %arg2[%c0_2, %c0_3, %c0_4] : memref<1x1x32xf32, #tpu.memory_space<vmem>>, vector<1x1x32xf32>
    %5 = math.sqrt %3 : vector<1x1x32xf32>
    %cst_5 = arith.constant dense<0.000000e+00> : vector<1x1xf32>
    %6 = vector.multi_reduction <add>, %5, %cst_5 [2] : vector<1x1x32xf32> to vector<1x1xf32>
    %7 = vector.shape_cast %6 : vector<1x1xf32> to vector<1x1x1xf32>
    %cst_6 = arith.constant 3.125000e-02 : f32
    %8 = vector.broadcast %cst_6 : f32 to vector<1x1x1xf32>
    %9 = arith.mulf %7, %8 : vector<1x1x1xf32>
    %cst_7 = arith.constant 9.99999997E-7 : f32
    %10 = vector.broadcast %cst_7 : f32 to vector<1x1x1xf32>
    %11 = arith.addf %9, %10 : vector<1x1x1xf32>
    %12 = tpu.reciprocal %11 {approx = true} : vector<1x1x1xf32> -> vector<1x1x1xf32>
    %13 = arith.mulf %11, %12 : vector<1x1x1xf32>
    %cst_8 = arith.constant 2.000000e+00 : f32
    %14 = vector.broadcast %cst_8 : f32 to vector<1x1x1xf32>
    %15 = arith.subf %14, %13 : vector<1x1x1xf32>
    %16 = arith.mulf %12, %15 : vector<1x1x1xf32>
    %17 = vector.broadcast %16 : vector<1x1x1xf32> to vector<1x1x32xf32>
    %18 = arith.mulf %5, %17 : vector<1x1x32xf32>
    %19 = arith.mulf %4, %18 : vector<1x1x32xf32>
    %cst_9 = arith.constant 1.000000e+00 : f32
    %20 = vector.broadcast %cst_9 : f32 to vector<1x1x32xf32>
    %21 = arith.addf %19, %20 : vector<1x1x32xf32>
    %22 = vector.broadcast %21 : vector<1x1x32xf32> to vector<1x8x32xf32>
    %23 = arith.mulf %0, %22 : vector<1x8x32xf32>
    %c0_10 = arith.constant 0 : index
    %c0_11 = arith.constant 0 : index
    %c0_12 = arith.constant 0 : index
    %24 = vector.load %arg3[%c0_10, %c0_11, %c0_12] : memref<1x1x32xf32, #tpu.memory_space<vmem>>, vector<1x1x32xf32>
    %25 = vector.broadcast %24 : vector<1x1x32xf32> to vector<1x8x32xf32>
    %26 = arith.addf %23, %25 : vector<1x8x32xf32>
    %c0_13 = arith.constant 0 : index
    %c0_14 = arith.constant 0 : index
    %c0_15 = arith.constant 0 : index
    %27 = vector.load %arg4[%c0_13, %c0_14, %c0_15] : memref<1x8x32xf32, #tpu.memory_space<vmem>>, vector<1x8x32xf32>
    tpu.vector_store %arg4[%c0_13, %c0_14, %c0_15], %26 {strides = array<i32>} : memref<1x8x32xf32, #tpu.memory_space<vmem>>, vector<1x8x32xf32>,
    return
  }
  func.func @transform_0(%arg0: i32) -> (i32, i32, i32) {
    %c0_i32 = arith.constant 0 : i32
    %c0_i32_0 = arith.constant 0 : i32
    %c0_i32_1 = arith.constant 0 : i32
    return %arg0, %c0_i32, %c0_i32_0 : i32, i32, i32
  }
  func.func @transform_1(%arg0: i32) -> (i32, i32, i32) {
    %c0_i32 = arith.constant 0 : i32
    %c0_i32_0 = arith.constant 0 : i32
    %c0_i32_1 = arith.constant 0 : i32
    %c0_i32_2 = arith.constant 0 : i32
    return %c0_i32, %c0_i32_0, %c0_i32_1 : i32, i32, i32
  }
  func.func @transform_2(%arg0: i32) -> (i32, i32, i32) {
    %c0_i32 = arith.constant 0 : i32
    %c0_i32_0 = arith.constant 0 : i32
    %c0_i32_1 = arith.constant 0 : i32
    %c0_i32_2 = arith.constant 0 : i32
    return %c0_i32, %c0_i32_0, %c0_i32_1 : i32, i32, i32
  }
  func.func @transform_3(%arg0: i32) -> (i32, i32, i32) {
    %c0_i32 = arith.constant 0 : i32
    %c0_i32_0 = arith.constant 0 : i32
    %c0_i32_1 = arith.constant 0 : i32
    return %arg0, %c0_i32, %c0_i32_0 : i32, i32, i32
  }
}

</mosaic_0001>

<bundles_post_ra>
// kernel: tpu_custom_call.1
= control target key start
LH: loop header
LB: loop body
LE: loop exit
PB: predicated region body
PF: predicated region fallthrough
CT: control target
= control target key end

     0   :  { %8 = vsyncpa [#allocation3], 0  ;;  %s673_s0 = inlined_call_operand.hbm [shape: f32[2,8,32], index: 0, kind: input, shape index: {}]   ;;  %s674_s1 = inlined_call_operand.vmem [shape: f32[1,1,32], index: 1, kind: input, shape index: {}]   ;;  %s675_s2 = inlined_call_operand.vmem [shape: f32[1,1,32], index: 2, kind: input, shape index: {}]   ;;  %s676_s3 = inlined_call_operand.hbm [shape: f32[2,8,32], index: 3, kind: output, shape index: {}]  }
   0x1   :  { %10 = vsyncpa [#allocation3 + $0x1], 0 }
   0x2   :  { %11 = vsyncpa [#allocation4], 0 }
   0x3   :  { %13 = vsyncpa [#allocation4 + $0x1], 0  ;;  %s499_s12 = smov 0   ;;  %s501_s13 = smov 0  }
   0x4   :  { %s503_s14 = smov 0   ;;  %s505_s15 = smov 0  }
   0x5 LB: > { %s520_s16 = sadd.s32 4294967295, %s475_s15   ;;  %s316_s17 = sadd.s32 4294967294, %s475_s15   ;;  %s475_s15 = sphi %s505_s15, %s691_s15   ;;  %s471_s14 = sphi %s503_s14, %s690_s14   ;;  %s467_s13 = sphi %s501_s13, %s689_s13   ;;  %s463_s12 = sphi %s499_s12, %s688_s12  }
   0x6   : > { %s524_s18 = sadd.s32 1, %s475_s15   ;;  %s26_s19 = sadd.s32 1, %s471_s14 }
   0x7   : > { %s23_s20 = ssub.s32 %s475_s15, %s524_s18  ;;  %p33_p0 = scmp.ne.s32.totalorder %s471_s14, %s467_s13 }
   0x8   : > { %p24_p1 = scmp.eq.s32.totalorder %s23_s20, 0  ;;  %p34_p2 = scmp.eq.s32.totalorder %s475_s15, 0 }
   0x9   : > { %p39_p3 = scmp.ne.s32.totalorder %s467_s13, %s463_s12  ;;  %p40_p4 = scmp.eq.s32.totalorder %s520_s16, 0 }
   0xa   : > { %s536_s21 = scalar_select %p24_p1, %s471_s14, %s26_s19  }
   0xb   : > { %p538_p5 = por %p34_p2, %p33_p0  ;;  %p542_p6 = por %p40_p4, %p39_p3 }
   0xc   : > { %p105_p7 = scmp.eq.s32.totalorder %s520_s16, 1  ;;  %p111_p8 = scmp.eq.s32.totalorder %s316_s17, 1 }
   0xd   : > { %p341_p10 = scmp.lt.s32.totalorder %s475_s15, 2  ;;  %s137_s26 = sand.u32 1, %s471_s14  }
   0xe   : > { %p549_p11 = por %p105_p7, %p33_p0  ;;  %p553_p12 = por %p111_p8, %p39_p3 }
   0xf   : > { %s320_s27 = sshll.u32 %s475_s15, 7  ;;  %s319_s28 = sshll.u32 %s137_s26, 3 }
  0x10   : > { %s680_s24 = scalar_select %p549_p11, 1, 0 }
  0x11   : > { %s681_s25 = scalar_select %p553_p12, 1, 0 }
  0x12   : > { %s562_s4 = scalar_lea.hbm %s673_s0, %s320_s27  ;;  %s141_s5 = scalar_lea.vmem [#allocation2], %s319_s28 }
  0x13   : > { %s148_s6 = sshll.u32 %s141_s5, 4  ;;  %p566_p13 = pnand %p341_p10, %p538_p5  ;;  %s570_s6 = int_to_ptr.vmem [resolvable:$true] %s148_s6 }
  0x14   : > { %s138_s8 = scalar_lea.sflag [#allocation3], %s137_s26  ;;  %s379_s9 = scalar_lea.hbm %s562_s4, 128 }
  0x15   : > { %p380_p2 = scmp.ne.s32.totalorder %s562_s4, %s379_s9  ;;  %p381_p3 = pneg %p566_p13 }
  0x16   : > { %s384_s17 = scalar_lea.hbm %s673_s0, 256  ;;  %p385_p5 = scmp.lt.u32.totalorder %s562_s4, %s673_s0 }
  0x17   : > { %p382_p4 = pnand %p381_p3, %p380_p2  ;;  %p386_p8 = scmp.lt.u32.totalorder %s384_s17, %s379_s9 }
  0x18   : > { %p388_p9 = scmp.lt.u32.totalorder %s379_s9, %s562_s4 }
  0x19   : > { %p383_p7 = pneg %p382_p4  ;;  %p387_p10 = por %p386_p8, %p385_p5 }
  0x1b   : > { %p389_p0 = por %p388_p9, %p387_p10 }
  0x1d   : > { %p390_p1 = pnand %p389_p0, %p383_p7 }
  0x1f   : > { %393 = shalt.err (!%p390_p1)
}
  0x20   : > { %s394_s22 = scalar_lea.vmem %s570_s6, 128  ;;  %s477_s26 = smov [#allocation2]  }
  0x21   : > { %p395_p2 = scmp.ne.s32.totalorder %s570_s6, %s394_s22  ;;  %s399_s27 = sshll.u32 %s477_s26, 4  ;;  %s400_s27 = int_to_ptr.vmem [resolvable:$false] %s399_s27 }
  0x22   : > { %s401_s28 = scalar_lea.vmem %s400_s27, 256  ;;  %p402_p11 = scmp.lt.s32.totalorder %s570_s6, %s400_s27 }
  0x23   : > { %p397_p4 = pnand %p395_p2, %p381_p3  ;;  %p403_p5 = scmp.lt.s32.totalorder %s401_s28, %s394_s22 }
  0x25   : > { %p398_p12 = pneg %p397_p4  ;;  %p404_p8 = por %p403_p5, %p402_p11 }
  0x27   : > { %p405_p9 = pnand %p404_p8, %p398_p12 }
  0x29   : > { %408 = shalt.err (!%p405_p9)
}
  0x2a   : > { %336 = dma.hbm_to_vmem [thread:$0]  (!%p566_p13), %s562_s4, 128, %s570_s6, %s138_s8  }
  0x2b   : > { %p683_p0 = scmp.lt.s32.totalorder %s475_s15, 3  ;;  %p684_p1 = scmp.ge.s32.totalorder %s475_s15, 1 }
  0x2d   : > { %p154_p3 = pnand %p684_p1, %p683_p0 }
  0x2e   : > { %s604_s29 = sand.u32 (!%p154_p3), 1, %s467_s13  }
  0x2f   : > { %157 = sbr.rel (%p154_p3) target bundleno = 276 (0x114), region = 32  ;;  %s322_s30 = sshll.u32 (!%p154_p3), %s604_s29, 3 }
  0x30   : > { %s160_s5 = scalar_lea.sflag (!%p154_p3), [#allocation3], %s604_s29  ;;  %s163_s7 = scalar_lea.vmem (!%p154_p3), [#allocation2], %s322_s30 }
  0x36   : > { %454 = dma.done.wait (%p542_p6), %s160_s5, 128  }
  0x37   : > { %456 = vsyncadd (%p542_p6), %s160_s5, 4294967168  ;;  %v186_v0 = vld [vmem:[%s163_s7] sm:$0xff]  ;;  %vm188_vm0 = vcmask 261120   ;;  %v217_v20 = vlaneseq  ;;  %s326_s9 = sshll.u32 %s520_s16, 7  ;;  %s185_s10 = scalar_lea.vmem [#allocation5], %s322_s30 }
  0x38   : > { %v187_v1 = vmul.f32 %v186_v0, %v186_v0  ;;  %v196_v24 = vld [vmem:[%s674_s1] sm:$0x1]  ;;  %s246_s11 = sshll.u32 %s185_s10, 4  ;;  %s628_s20 = scalar_lea.hbm %s676_s3, %s326_s9  ;;  %s630_s11 = int_to_ptr.vmem [resolvable:$true] %s246_s11 }
  0x39   : > { %v218_v23 = vshrl.u32 %v217_v20, 7  ;;  %v324_v30 = vld [vmem:[%s675_s2] ss:$0 sm:$0xff]  ;;  %s233_s22 = scalar_lea.sflag [#allocation4], %s604_s29  ;;  %s409_s26 = scalar_lea.vmem %s630_s11, 128 }
  0x3a   : > { %v189_v2 = vsel %vm188_vm0, %v187_v1, 0.0  ;;  %p410_p6 = scmp.ne.s32.totalorder %s630_s11, %s409_s26  ;;  %p685_p11 = scmp.ne.s32.totalorder %s680_s24, 0 }
  0x3b   : > { %v190_v3 = vrot.slane %v189_v2, 4  ;;  %v219_v27 = vsub.s32 0, %v218_v23  ;;  %s478_s16 = smov [#allocation5]  }
  0x3c   : > { %p411_p12 = pnand %p410_p6, %p685_p11  ;;  %s413_s27 = sshll.u32 %s478_s16, 4  ;;  %s414_s27 = int_to_ptr.vmem [resolvable:$false] %s413_s27 }
  0x3d   : > { %v191_v4 = vadd.f32 %v190_v3, %v189_v2  ;;  %s415_s28 = scalar_lea.vmem %s414_s27, 256  ;;  %p416_p7 = scmp.lt.s32.totalorder %s630_s11, %s414_s27 }
  0x3e   : > { %p412_p13 = pneg %p411_p12  ;;  %p417_p10 = scmp.lt.s32.totalorder %s415_s28, %s409_s26 }
  0x3f   : > { %v192_v5 = vrot.slane %v191_v4, 2 }
  0x40   : > { %p418_p2 = por %p417_p10, %p416_p7 }
  0x41   : > { %v193_v6 = vadd.f32 %v192_v5, %v191_v4 }
  0x42   : > { %p419_p4 = pnand %p418_p2, %p412_p13 }
  0x43   : > { %v194_v7 = vrot.slane %v193_v6, 1 }
  0x45   : > { %v195_v8 = vadd.f32 %v194_v7, %v193_v6 }
  0x47   : > { %375 = vrsqrt.f32 %v195_v8  ;;  %vm199_vm1 = vcmp.eq.f32.partialorder %v195_v8, inf  ;;  %v202_v10 = vand.u32 2147483648, %v195_v8  ;;  %vm201_vm2 = vcmp.eq.f32.partialorder %v195_v8, 0.0 }
  0x51   : > { %v376_v9 = vpop.eup %375 }
  0x52   : > { %v198_v11 = vmul.f32 %v376_v9, %v195_v8 }
  0x54   : > { %v200_v12 = vsel %vm199_vm1, %v195_v8, %v198_v11 }
  0x55   : > { %v203_v13 = vsel %vm201_vm2, %v202_v10, %v200_v12 }
  0x56   : > { %v204_v14 = vsel %vm188_vm0, %v203_v13, 0.0 }
  0x57   : > { %205 = vadd.xlane.f32.xlu0 %v204_v14 }
  0xe4   : > { %v206_v15 = vpop.xlane.xlu0 %205 }
  0xe5   : > { %v207_v16 = vmul.f32 0.03125, %v206_v15 }
  0xe7   : > { %v208_v17 = vadd.f32 1e-06, %v207_v16 }
  0xe9   : > { %377 = vrcp.f32 %v208_v17 }
  0xf3   : > { %v378_v18 = vpop.eup %377 }
  0xf4   : > { %v210_v19 = vmul.f32 %v378_v18, %v208_v17 }
  0xf6   : > { %v211_v21 = vsub.f32 2.0, %v210_v19 }
  0xf8   : > { %v212_v22 = vmul.f32 %v378_v18, %v211_v21 }
  0xfa   : > { %v213_v25 = vmul.f32 %v212_v22, %v203_v13 }
  0xfc   : > { %v214_v26 = vmul.f32 %v213_v25, %v196_v24 }
  0xfe   : > { %v215_v28 = vadd.f32 1.0, %v214_v26 }
 0x100   : > { %v220_v29 = vrot.slane %v215_v28, %v219_v27 }
 0x102   : > { %v222_v31 = vmul.f32 %v220_v29, %v186_v0 }
 0x104   : > { %v230_v32 = vadd.f32 %v324_v30, %v222_v31 }
 0x106   : > { %231 = vst.msk [vmem:[%s185_s10] sm:$0xff] %vm188_vm0, %v230_v32 }
 0x107   : > { %422 = shalt.err (!%p419_p4)
}
 0x108   : > { %s423_s29 = scalar_lea.hbm %s628_s20, 128  ;;  %s427_s7 = scalar_lea.hbm %s676_s3, 256 }
 0x109   : > { %p424_p5 = scmp.ne.s32.totalorder %s628_s20, %s423_s29  ;;  %p428_p0 = scmp.lt.u32.totalorder %s628_s20, %s676_s3 }
 0x10a   : > { %p429_p1 = scmp.lt.u32.totalorder %s427_s7, %s423_s29  ;;  %p431_p6 = scmp.lt.u32.totalorder %s423_s29, %s628_s20 }
 0x10b   : > { %p425_p8 = pnand %p424_p5, %p685_p11 }
 0x10c   : > { %p430_p3 = por %p429_p1, %p428_p0 }
 0x10d   : > { %p426_p9 = pneg %p425_p8 }
 0x10e   : > { %p432_p12 = por %p431_p6, %p430_p3 }
 0x110   : > { %p433_p13 = pnand %p432_p12, %p426_p9 }
 0x112   : > { %436 = shalt.err (!%p433_p13)
}
 0x113   : > { %331 = dma.vmem_to_hbm [thread:$0]  (%p685_p11), %s630_s11, 128, %s628_s20, %s233_s22  }
 0x114 PF: > { %s258_s6 = sand.u32 1, %s463_s12   ;;  %p686_p7 = scmp.ne.s32.totalorder %s681_s25, 0 }
 0x115   : > { %p687_p10 = scmp.ge.s32.totalorder %s475_s15, 2  ;;  %s259_s8 = scalar_lea.sflag [#allocation4], %s258_s6 }
 0x117   : > { %p338_p2 = pnand %p687_p10, %p686_p7 }
 0x119   : > { %458 = dma.done.wait (!%p338_p2), %s259_s8, 128  }
 0x11a   : > { %460 = vsyncadd (!%p338_p2), %s259_s8, 4294967168  ;;  %p16_p4 = scmp.ge.s32.totalorder %s524_s18, 4   ;;  %s688_s12 = smov %s467_s13 }
 0x11b   : > { %s689_s13 = smov %s471_s14  ;;  %s690_s14 = smov %s536_s21 }
 0x11c   : > { %s691_s15 = smov %s524_s18  ;;  %18 = sbr.rel (!%p16_p4) target bundleno = 5 (0x5), region = 77 }
 0x123   :  { %264 = vsyncpa [#allocation3], 1 }
 0x124   :  { %266 = vsyncpa [#allocation3 + $0x1], 1 }
 0x125   :  { %267 = vsyncpa [#allocation4], 1 }
 0x126   :  { %269 = vsyncpa [#allocation4 + $0x1], 1 }

</bundles_post_ra>
